<compile_context>
chip_gen: v5e
topology: v5e:2x2
jax: 0.10.0
libtpu: 0.0.40
codegen_flags: <defaults>
</compile_context>

<pallas_src>
import math

import numpy as np
import jax
import jax.numpy as jnp
from jax.experimental import pallas as pl
from jax.experimental.pallas import tpu as pltpu


def _rup(v, m):
    return (v + m - 1) // m * m


def _pick_row_tile(oh, cap):
    # Largest divisor of OH that is <= cap and sublane-aligned (multiple of 8); otherwise
    # fall back to the full height (block dim == array dim is also a legal block shape).
    for t in range(min(oh, cap), 0, -1):
        if oh % t == 0 and t % 8 == 0:
            return t
    return oh


def _make_conv_acc(n_rows, TH, P):
    """acc[th, (ph, ow, co)] = sum_i  x_rows[i + th, :] @ B[i]   (f32 accumulation)."""

    def conv_acc(x_ref, b_ref):
        acc = jnp.zeros((TH, P), jnp.float32)
        for i in range(n_rows):                      # static unroll; n_rows is tiny (3)
            lhs = x_ref[0, 0, pl.ds(i, TH), :]       # (TH, Wq*Cin) contiguous, lane-dense
            acc = acc + jnp.dot(lhs, b_ref[i], preferred_element_type=jnp.float32)
        return acc

    return conv_acc


def _make_stats_kernel(conv_acc):
    def stats_kernel(x_ref, b_ref, pilot_ref, part_ref):
        yc = conv_acc(x_ref, b_ref) - pilot_ref[...]            # pilot-centered, f32
        part_ref[0, 0, 0:1, :] = jnp.sum(yc, axis=0, keepdims=True)
        part_ref[0, 0, 1:2, :] = jnp.sum(yc * yc, axis=0, keepdims=True)

    return stats_kernel


def _make_out_kernel(conv_acc):
    def out_kernel(x_ref, b_ref, scale_ref, shift_ref, o_ref):
        z = conv_acc(x_ref, b_ref) * scale_ref[...] + shift_ref[...]
        # ELU(alpha=1).  exp(z)-1 kept over expm1 (guaranteed Mosaic lowering, ~1e-7 off
        # near 0); the min() clamp only avoids a harmless inf in the untaken branch.
        z = jnp.where(z > 0.0, z, jnp.exp(jnp.minimum(z, 0.0)) - 1.0)
        o_ref[0] = z.astype(o_ref.dtype)             # (TH, nphase*OW*Cout): lane-dense vst

    return out_kernel


def upconv_forward(x_nchw, w_oihw, b, gamma, beta, *, kernel_size, scale,
                   max_row_tile=128, eps=1e-5, staging_dtype=jnp.bfloat16):
    """UpConv(num_in, num_out, kernel_size, scale).forward on NCHW float32 inputs.

    `b` (conv bias) is accepted for API parity but unused: training-mode BatchNorm2d
    subtracts the batch mean right after the conv, cancelling a per-channel bias exactly.
    `staging_dtype=bf16` (default) halves HBM traffic on v6e/v7x; pass jnp.float32 for
    strict f32 parity (all accumulation / BN math / output are f32 either way).
    """
    if kernel_size % 2 != 1:
        raise NotImplementedError("odd kernel_size only ('same' conv output size)")
    scale = int(scale)
    N, Cin, H, W = x_nchw.shape
    Cout = w_oihw.shape[0]
    K = kernel_size
    p = (K - 1) // 2
    nphase = scale * scale
    OH, OW = H, W                                    # per-phase output grid; Ho = scale*OH

    # ---- static stencil geometry of the (nearest upsample -> 'same' conv) decomposition
    d = lambda r, k: (r + k - p) // scale            # python // == floor, also negatives
    dmin, dmax = d(0, 0), d(scale - 1, K - 1)
    pad_lo, pad_hi = -dmin, dmax
    halo = pad_lo + pad_hi
    n_rows = halo + 1                                # distinct input-row offsets
    Wq = W + halo
    WC = Wq * Cin                                    # staged-input lane width (last dim)
    P = nphase * OW * Cout                           # output lane width, index (ph, ow, co)

    # ---- banded per-row-offset weight matrix B[i] : (WC, P), built once host-side.
    # B[i][w'*Cin+c, ((rh*s+rw)*OW+ow)*Cout+co] = sum of the original KxK taps that, after
    # the nearest upsample, read padded input (row offset i, column w') for output
    # (phase (rh,rw), column ow).
    S = np.zeros((n_rows, Wq, scale, scale, OW, K, K), np.float32)
    ow_idx = np.arange(OW)
    for rh in range(scale):
        for kh in range(K):
            i = d(rh, kh) - dmin
            for rw in range(scale):
                for kw in range(K):
                    j = d(rw, kw) - dmin
                    S[i, ow_idx + j, rh, rw, ow_idx, kh, kw] = 1.0
    w32 = w_oihw.astype(jnp.float32)
    B = jnp.einsum("iwhvakl,ockl->iwchvao", jnp.asarray(S), w32)
    B = B.reshape(n_rows, WC, P).astype(staging_dtype)

    # ---- halo'd row-tiled, lane-dense input staging: (N, n_t, TH+halo, Wq*Cin)
    TH = _pick_row_tile(OH, max_row_tile)
    n_t = OH // TH
    x_nhwc = jnp.transpose(x_nchw, (0, 2, 3, 1)).astype(jnp.float32)
    xq = jnp.pad(x_nhwc, ((0, 0), (pad_lo, pad_hi), (pad_lo, pad_hi), (0, 0)))
    row_idx = jnp.arange(n_t)[:, None] * TH + jnp.arange(TH + halo)[None, :]
    x_tiles = xq[:, row_idx, :, :].reshape(N, n_t, TH + halo, WC).astype(staging_dtype)

    # ---- per-output-channel pilot mean (kills E[y^2]-E[y]^2 cancellation in pass 1)
    xmean = jnp.mean(x_nchw.astype(jnp.float32), axis=(0, 2, 3))            # (Cin,)
    pilot = jnp.einsum("ockl,c->o", w32, xmean)                              # (Cout,)
    pilot_row = jnp.tile(pilot, nphase * OW).reshape(1, P)

    conv_acc = _make_conv_acc(n_rows, TH, P)

    x_spec = pl.BlockSpec((1, 1, TH + halo, WC), lambda n, t: (n, t, 0, 0))
    b_spec = pl.BlockSpec((n_rows, WC, P), lambda n, t: (0, 0, 0))
    row_spec = pl.BlockSpec((1, P), lambda n, t: (0, 0))

    itm = jnp.dtype(staging_dtype).itemsize
    est = 2 * (_rup(TH + halo, 16) * _rup(WC, 128) * itm          # double-buffered input
               + n_rows * _rup(WC, 16) * _rup(P, 128) * itm       # banded weights
               + _rup(TH, 8) * _rup(P, 128) * 4) + (2 << 20)      # output block + slack
    cp = pltpu.CompilerParams(dimension_semantics=("parallel", "parallel"),
                              vmem_limit_bytes=int(max(est, 16 << 20)))

    # ---- pass 1: per-(batch, row-tile) pilot-centered sum / sum-of-squares for BN stats
    partials = pl.pallas_call(
        _make_stats_kernel(conv_acc),
        out_shape=jax.ShapeDtypeStruct((N, n_t, 2, P), jnp.float32),
        grid=(N, n_t),
        in_specs=[x_spec, b_spec, row_spec],
        out_specs=pl.BlockSpec((1, 1, 2, P), lambda n, t: (n, t, 0, 0)),
        compiler_params=cp,
    )(x_tiles, B, pilot_row)

    count = float(N * nphase * OH * OW)              # = N * Ho * Wo
    sums = jnp.sum(partials, axis=(0, 1)).reshape(2, nphase * OW, Cout).sum(axis=1)
    mean = pilot + sums[0] / count
    var = jnp.maximum(sums[1] / count - (sums[0] / count) ** 2, 0.0)   # biased batch var
    bn_scale = gamma.astype(jnp.float32) * jax.lax.rsqrt(var + eps)
    bn_shift = beta.astype(jnp.float32) - mean * bn_scale
    scale_row = jnp.tile(bn_scale, nphase * OW).reshape(1, P)
    shift_row = jnp.tile(bn_shift, nphase * OW).reshape(1, P)

    # ---- pass 2: conv recompute (same staged B) + in-kernel BN affine + ELU
    o3 = pl.pallas_call(
        _make_out_kernel(conv_acc),
        out_shape=jax.ShapeDtypeStruct((N, OH, P), jnp.float32),
        grid=(N, n_t),
        in_specs=[x_spec, b_spec, row_spec, row_spec],
        out_specs=pl.BlockSpec((1, TH, P), lambda n, t: (n, t, 0)),
        compiler_params=cp,
    )(x_tiles, B, scale_row, shift_row)

    # Lane axis (ph, ow, co) -> NCHW.  The single transpose the NCHW module interface
    # forces also performs the phase interleave (no extra HBM pass beyond it).
    o6 = o3.reshape(N, OH, scale, scale, OW, Cout)
    return jnp.transpose(o6, (0, 5, 1, 2, 4, 3)).reshape(N, Cout, scale * OH, scale * OW)


def _reference(x, w, b, gamma, beta, *, kernel_size, scale, eps=1e-5):
    """Pure-JAX/XLA reference of the same forward (upsample -> pad -> conv -> BN -> ELU)."""
    Cout = w.shape[0]
    K = kernel_size
    xu = jnp.repeat(jnp.repeat(x, scale, axis=2), scale, axis=3)
    p = (K - 1) // 2
    xp = jnp.pad(xu, ((0, 0), (0, 0), (p, p), (p, p)))
    y = jax.lax.conv_general_dilated(
        xp, w, window_strides=(1, 1), padding="VALID",
        dimension_numbers=("NCHW", "OIHW", "NCHW"))
    y = y + b.reshape(1, Cout, 1, 1)
    mean = jnp.mean(y, axis=(0, 2, 3), keepdims=True)
    var = jnp.mean((y - mean) ** 2, axis=(0, 2, 3), keepdims=True)
    y = (y - mean) * jax.lax.rsqrt(var + eps)
    y = y * gamma.reshape(1, Cout, 1, 1) + beta.reshape(1, Cout, 1, 1)
    return jnp.where(y > 0, y, jnp.expm1(y))


if __name__ == "__main__":
    # UpConv(num_in=4, num_out=8, kernel_size=3, scale=2) on a (2, 4, 16, 16) input.
    key = jax.random.PRNGKey(0)
    k1, k2, k3, k4, k5 = jax.random.split(key, 5)

    N, Cin, H, W = 2, 4, 16, 16
    Cout, K, scale = 8, 3, 2

    x = jax.random.normal(k1, (N, Cin, H, W), jnp.float32)
    fan_in = Cin * K * K
    bound = 1.0 / math.sqrt(fan_in)
    w = jax.random.uniform(k2, (Cout, Cin, K, K), jnp.float32, -bound, bound)
    b = jax.random.uniform(k3, (Cout,), jnp.float32, -bound, bound)
    gamma = jax.random.uniform(k4, (Cout,), jnp.float32, 0.5, 1.5)
    beta = jax.random.uniform(k5, (Cout,), jnp.float32, -0.5, 0.5)

    ref = _reference(x, w, b, gamma, beta, kernel_size=K, scale=scale)

    # f32 staging: strict parity check.  max_row_tile=8 -> 2 row tiles per batch, so the
    # (N, n_t) = (2, 2) grid exercises the row-tiled halo staging and keeps >=2 parallel
    # steps per axis (v7x 2-TC friendly).
    out = upconv_forward(x, w, b, gamma, beta, kernel_size=K, scale=scale,
                         max_row_tile=8, staging_dtype=jnp.float32)
    out = jax.block_until_ready(out)
    assert out.shape == (N, Cout, H * scale, W * scale), out.shape
    err = float(jnp.max(jnp.abs(out - ref)))
    assert jnp.allclose(out, ref, atol=1e-3, rtol=1e-3), err

    # bf16 staging (default path for v6e/v7x bandwidth): looser tolerance, f32 accumulate.
    out_bf = upconv_forward(x, w, b, gamma, beta, kernel_size=K, scale=scale,
                            max_row_tile=8)
    out_bf = jax.block_until_ready(out_bf)
    err_bf = float(jnp.max(jnp.abs(out_bf - ref)))
    assert jnp.allclose(out_bf, ref, atol=7.5e-2, rtol=5e-2), err_bf

    print("KERNEL_OK")
</pallas_src>

<mosaic_0001>
module attributes {stable_mosaic.version = 11 : i64} {
  func.func @stats_kernel(%arg0: i32, %arg1: i32, %arg2: memref<1x1x10x72xf32, #tpu.memory_space<vmem>>, %arg3: memref<3x72x512xf32, #tpu.memory_space<vmem>>, %arg4: memref<1x512xf32, #tpu.memory_space<vmem>>, %arg5: memref<1x1x2x512xf32, #tpu.memory_space<vmem>>) attributes {dimension_semantics = [#tpu.dimension_semantics<parallel>, #tpu.dimension_semantics<parallel>], iteration_bounds = array<i64: 2, 2>, scalar_prefetch = 0 : i64, scratch_operands = 0 : i64, tpu.core_type = #tpu.core_type<tc>, window_params = [{transform_indices = @transform_0, window_bounds = array<i64: 1, 1, 10, 72>}, {pipeline_mode = #tpu.pipeline_mode<synchronous>, transform_indices = @transform_1, window_bounds = array<i64: 3, 72, 512>}, {pipeline_mode = #tpu.pipeline_mode<synchronous>, transform_indices = @transform_2, window_bounds = array<i64: 1, 512>}, {transform_indices = @transform_3, window_bounds = array<i64: 1, 1, 2, 512>}]} {
    %cst = arith.constant 0.000000e+00 : f32
    %0 = vector.broadcast %cst : f32 to vector<8x512xf32>
    %c0 = arith.constant 0 : index
    %c0_0 = arith.constant 0 : index
    %c0_1 = arith.constant 0 : index
    %c0_2 = arith.constant 0 : index
    %1 = vector.load %arg2[%c0, %c0_0, %c0_1, %c0_2] : memref<1x1x10x72xf32, #tpu.memory_space<vmem>>, vector<1x1x8x72xf32>
    %2 = vector.shape_cast %1 : vector<1x1x8x72xf32> to vector<8x72xf32>
    %c0_3 = arith.constant 0 : index
    %c0_4 = arith.constant 0 : index
    %c0_5 = arith.constant 0 : index
    %3 = vector.load %arg3[%c0_3, %c0_4, %c0_5] : memref<3x72x512xf32, #tpu.memory_space<vmem>>, vector<1x72x512xf32>
    %4 = vector.shape_cast %3 : vector<1x72x512xf32> to vector<72x512xf32>
    %cst_6 = arith.constant dense<0.000000e+00> : vector<8x512xf32>
    %5 = tpu.matmul %2, %4, %cst_6 {dimension_numbers = #tpu.dot_dimension_numbers<[1], [0], [0], [1], [0, 0, 1, 1], [], []>} : vector<8x72xf32>, vector<72x512xf32>, vector<8x512xf32> -> vector<8x512xf32>
    %6 = arith.addf %0, %5 : vector<8x512xf32>
    %c0_7 = arith.constant 0 : index
    %c0_8 = arith.constant 0 : index
    %c1 = arith.constant 1 : index
    %c0_9 = arith.constant 0 : index
    %7 = vector.load %arg2[%c0_7, %c0_8, %c1, %c0_9] : memref<1x1x10x72xf32, #tpu.memory_space<vmem>>, vector<1x1x8x72xf32>
    %8 = vector.shape_cast %7 : vector<1x1x8x72xf32> to vector<8x72xf32>
    %c1_10 = arith.constant 1 : index
    %c0_11 = arith.constant 0 : index
    %c0_12 = arith.constant 0 : index
    %9 = vector.load %arg3[%c1_10, %c0_11, %c0_12] : memref<3x72x512xf32, #tpu.memory_space<vmem>>, vector<1x72x512xf32>
    %10 = vector.shape_cast %9 : vector<1x72x512xf32> to vector<72x512xf32>
    %cst_13 = arith.constant dense<0.000000e+00> : vector<8x512xf32>
    %11 = tpu.matmul %8, %10, %cst_13 {dimension_numbers = #tpu.dot_dimension_numbers<[1], [0], [0], [1], [0, 0, 1, 1], [], []>} : vector<8x72xf32>, vector<72x512xf32>, vector<8x512xf32> -> vector<8x512xf32>
    %12 = arith.addf %6, %11 : vector<8x512xf32>
    %c0_14 = arith.constant 0 : index
    %c0_15 = arith.constant 0 : index
    %c2 = arith.constant 2 : index
    %c0_16 = arith.constant 0 : index
    %13 = vector.load %arg2[%c0_14, %c0_15, %c2, %c0_16] : memref<1x1x10x72xf32, #tpu.memory_space<vmem>>, vector<1x1x8x72xf32>
    %14 = vector.shape_cast %13 : vector<1x1x8x72xf32> to vector<8x72xf32>
    %c2_17 = arith.constant 2 : index
    %c0_18 = arith.constant 0 : index
    %c0_19 = arith.constant 0 : index
    %15 = vector.load %arg3[%c2_17, %c0_18, %c0_19] : memref<3x72x512xf32, #tpu.memory_space<vmem>>, vector<1x72x512xf32>
    %16 = vector.shape_cast %15 : vector<1x72x512xf32> to vector<72x512xf32>
    %cst_20 = arith.constant dense<0.000000e+00> : vector<8x512xf32>
    %17 = tpu.matmul %14, %16, %cst_20 {dimension_numbers = #tpu.dot_dimension_numbers<[1], [0], [0], [1], [0, 0, 1, 1], [], []>} : vector<8x72xf32>, vector<72x512xf32>, vector<8x512xf32> -> vector<8x512xf32>
    %18 = arith.addf %12, %17 : vector<8x512xf32>
    %c0_21 = arith.constant 0 : index
    %c0_22 = arith.constant 0 : index
    %19 = vector.load %arg4[%c0_21, %c0_22] : memref<1x512xf32, #tpu.memory_space<vmem>>, vector<1x512xf32>
    %20 = vector.broadcast %19 : vector<1x512xf32> to vector<8x512xf32>
    %21 = arith.subf %18, %20 : vector<8x512xf32>
    %cst_23 = arith.constant dense<0.000000e+00> : vector<512xf32>
    %22 = vector.multi_reduction <add>, %21, %cst_23 [0] : vector<8x512xf32> to vector<512xf32>
    %23 = vector.shape_cast %22 : vector<512xf32> to vector<1x512xf32>
    %c0_24 = arith.constant 0 : index
    %c0_25 = arith.constant 0 : index
    %c0_26 = arith.constant 0 : index
    %c0_27 = arith.constant 0 : index
    %24 = vector.load %arg5[%c0_24, %c0_25, %c0_26, %c0_27] : memref<1x1x2x512xf32, #tpu.memory_space<vmem>>, vector<1x1x1x512xf32>
    %25 = vector.shape_cast %24 : vector<1x1x1x512xf32> to vector<1x512xf32>
    %26 = vector.shape_cast %23 : vector<1x512xf32> to vector<1x1x1x512xf32>
    tpu.vector_store %arg5[%c0_24, %c0_25, %c0_26, %c0_27], %26 {strides = array<i32>} : memref<1x1x2x512xf32, #tpu.memory_space<vmem>>, vector<1x1x1x512xf32>,
    %27 = arith.mulf %21, %21 : vector<8x512xf32>
    %cst_28 = arith.constant dense<0.000000e+00> : vector<512xf32>
    %28 = vector.multi_reduction <add>, %27, %cst_28 [0] : vector<8x512xf32> to vector<512xf32>
    %29 = vector.shape_cast %28 : vector<512xf32> to vector<1x512xf32>
    %c0_29 = arith.constant 0 : index
    %c0_30 = arith.constant 0 : index
    %c1_31 = arith.constant 1 : index
    %c0_32 = arith.constant 0 : index
    %30 = vector.load %arg5[%c0_29, %c0_30, %c1_31, %c0_32] : memref<1x1x2x512xf32, #tpu.memory_space<vmem>>, vector<1x1x1x512xf32>
    %31 = vector.shape_cast %30 : vector<1x1x1x512xf32> to vector<1x512xf32>
    %32 = vector.shape_cast %29 : vector<1x512xf32> to vector<1x1x1x512xf32>
    tpu.vector_store %arg5[%c0_29, %c0_30, %c1_31, %c0_32], %32 {strides = array<i32>} : memref<1x1x2x512xf32, #tpu.memory_space<vmem>>, vector<1x1x1x512xf32>,
    return
  }
  func.func @transform_0(%arg0: i32, %arg1: i32) -> (i32, i32, i32, i32) {
    %c0_i32 = arith.constant 0 : i32
    %c0_i32_0 = arith.constant 0 : i32
    %c0_i32_1 = arith.constant 0 : i32
    return %arg0, %arg1, %c0_i32, %c0_i32_0 : i32, i32, i32, i32
  }
  func.func @transform_1(%arg0: i32, %arg1: i32) -> (i32, i32, i32) {
    %c0_i32 = arith.constant 0 : i32
    %c0_i32_0 = arith.constant 0 : i32
    %c0_i32_1 = arith.constant 0 : i32
    %c0_i32_2 = arith.constant 0 : i32
    return %c0_i32, %c0_i32_0, %c0_i32_1 : i32, i32, i32
  }
  func.func @transform_2(%arg0: i32, %arg1: i32) -> (i32, i32) {
    %c0_i32 = arith.constant 0 : i32
    %c0_i32_0 = arith.constant 0 : i32
    %c0_i32_1 = arith.constant 0 : i32
    return %c0_i32, %c0_i32_0 : i32, i32
  }
  func.func @transform_3(%arg0: i32, %arg1: i32) -> (i32, i32, i32, i32) {
    %c0_i32 = arith.constant 0 : i32
    %c0_i32_0 = arith.constant 0 : i32
    %c0_i32_1 = arith.constant 0 : i32
    return %arg0, %arg1, %c0_i32, %c0_i32_0 : i32, i32, i32, i32
  }
}

</mosaic_0001>

<bundles_post_ra>
// kernel: tpu_custom_call.1
= control target key start
LH: loop header
LB: loop body
LE: loop exit
PB: predicated region body
PF: predicated region fallthrough
CT: control target
= control target key end

     0   :  { %8 = vsyncpa [#allocation3], 0  ;;  %s1242_s0 = inlined_call_operand.vmem [shape: f32[2,2,10,72], index: 0, kind: input, shape index: {}]   ;;  %s1243_s1 = inlined_call_operand.hbm [shape: f32[3,72,512], index: 1, kind: input, shape index: {}]   ;;  %s1244_s2 = inlined_call_operand.vmem [shape: f32[1,512], index: 2, kind: input, shape index: {}]   ;;  %s1245_s3 = inlined_call_operand.hbm [shape: f32[2,2,2,512], index: 3, kind: output, shape index: {}]  }
   0x1   :  { %9 = vsyncpa [#allocation4], 0 }
   0x2   :  { %11 = vsyncpa [#allocation4 + $0x1], 0  ;;  %s1059_s12 = smov 0   ;;  %s1061_s13 = smov 0  }
   0x3   :  { %s1063_s14 = smov 0   ;;  %s1065_s15 = smov 0  }
   0x4   :  { %s1067_s16 = smov 0   ;;  %s1069_s17 = smov 0  }
   0x5   :  { %s1071_s18 = smov 0   ;;  %s1073_s19 = smov 0  }
   0x6 LB: > { %s792_s20 = sadd.s32 4294967295, %s1034_s19   ;;  %s793_s21 = sadd.s32 4294967294, %s1034_s19   ;;  %s1034_s19 = sphi %s1073_s19, %s17_s19   ;;  %s1030_s18 = sphi %s1071_s18, %s1256_s18   ;;  %s1026_s17 = sphi %s1069_s17, %s1255_s17   ;;  %s1022_s16 = sphi %s1067_s16, %s1254_s16   ;;  %s1018_s15 = sphi %s1065_s15, %s1253_s15   ;;  %s1014_s14 = sphi %s1063_s14, %s1252_s14   ;;  %s1010_s13 = sphi %s1061_s13, %s1251_s13   ;;  %s1006_s12 = sphi %s1059_s12, %s1250_s12  }
   0x7   : > { %s26_s22 = sadd.s32 1, %s1026_s17  ;;  %s29_s23 = sadd.s32 1, %s1030_s18 }
   0x8   : > { %p27_p0 = scmp.ge.s32.totalorder %s26_s22, 2  ;;  %s108_s24 = sadd.s32 1, %s1014_s14 }
   0x9   : > { %p118_p1 = scmp.ne.s32.totalorder %s1014_s14, %s1010_s13  ;;  %p119_p2 = scmp.eq.s32.totalorder %s792_s20, 3 }
   0xa   : > { %s1258_s22 = smov (%p27_p0, %s26_s22), 0  ;;  %s1260_s23 = smov (!%p27_p0, %s29_s23), %s1030_s18 }
   0xb   : > { %s104_s25 = ssub.s32 %s1026_s17, %s1258_s22  ;;  %p1111_p3 = por %p119_p2, %p118_p1 }
   0xc   : > { %p31_p4 = scmp.ge.s32.totalorder %s1260_s23, 2  ;;  %p124_p5 = scmp.ne.s32.totalorder %s1010_s13, %s1006_s12 }
   0xd   : > { %p125_p6 = scmp.eq.s32.totalorder %s793_s21, 3  ;;  %p794_p7 = scmp.ge.s32.totalorder %s1034_s19, 1 }
   0xe   : > { %s1262_s23 = smov (%p31_p4, %s1260_s23), 0  ;;  %p132_p9 = scmp.lt.s32.totalorder %s1034_s19, 5 }
   0xf   : > { %p1120_p8 = por %p125_p6, %p124_p5  ;;  %s103_s28 = ssub.s32 %s1030_s18, %s1262_s23 }
  0x10   : > { %s105_s29 = sor.u32 %s104_s25, %s103_s28  ;;  %p1127_p10 = pnand %p794_p7, %p132_p9 }
  0x11   : > { %p106_p11 = scmp.eq.s32.totalorder %s105_s29, 0  ;;  %p1131_p12 = scmp.eq.s32.totalorder %s792_s20, 0 }
  0x12   : > { %p828_p13 = pneg %p1127_p10  ;;  %s143_s7 = sshll.u32 %s1243_s1, 4  ;;  %s144_s7 = int_to_ptr.hbm [resolvable:$true] %s143_s7 }
  0x13   : > { %s1141_s8 = scalar_select %p106_p11, %s1014_s14, %s108_s24  }
  0x14   : > { %s1036_s9 = smov [#allocation2]   ;;  %p829_p0 = pnand %p1131_p12, %p828_p13 }
  0x15   : > { %s145_s10 = sshll.u32 %s1036_s9, 4  ;;  %s1037_s11 = smov 512   ;;  %s146_s10 = int_to_ptr.vmem [resolvable:$true] %s145_s10 }
  0x16   : > { %s1038_s20 = smov 32   ;;  %176 = sbr.rel (%p1127_p10) target bundleno = 245 (0xf5), region = 32 }
  0x17   : > { %831 = dma.hbm_to_vmem [thread:$0]  (!%p829_p0), %s144_s7, 13824, %s146_s10, [#allocation3], %s1037_s11, %s1037_s11, %s1038_s20  }
  0x1b   : > { %997 = dma.done.wait (%p1131_p12), [#allocation3], 13824  }
  0x1c   : > { %999 = vsyncadd (%p1131_p12), [#allocation3], 4294953472  ;;  %v285_v0 = vld [vmem:[#allocation2 + $0x220] sm:$0xff]  ;;  %v286_v1 = vld [vmem:[#allocation2 + $0x228] sm:$0xff]  ;;  %p205_p1 = scmp.lt.s32.totalorder %s1022_s16, 1  ;;  %p207_p2 = scmp.lt.s32.totalorder %s1018_s15, 1 }
  0x1d   : > { %v287_v2 = vld [vmem:[#allocation2 + $0x230] sm:$0xff]  ;;  %300 = vmatpush.msra.mxu0 %v285_v0  ;;  %320 = vmatpush.msra.mxu1 %v286_v1  ;;  %v288_v3 = vld [vmem:[#allocation2 + $0x238] sm:$0xff]  ;;  %v281_v4 = vld [vmem:[#allocation2 + $0x200] sm:$0xff]  ;;  %vm289_vm0 = vcmask 588800   ;;  %s817_s10 = sshll.u32 %s1018_s15, 2  ;;  %s818_s11 = sshll.u32 %s1022_s16, 3 }
  0x1e   : > { %v282_v5 = vld [vmem:[#allocation2 + $0x208] sm:$0xff]  ;;  %340 = vmatpush.msra.mxu2 %v287_v2  ;;  %360 = vmatpush.msra.mxu3 %v288_v3  ;;  %v283_v6 = vld [vmem:[#allocation2 + $0x210] sm:$0xff]  ;;  %v284_v7 = vld [vmem:[#allocation2 + $0x218] sm:$0xff]  ;;  %s1156_s21 = scalar_select %p205_p1, %s1022_s16, 1  ;;  %vm626_vm1 = vcmask 1040384   ;;  %vm628_vm2 = vcmask 1042434  }
  0x1f   : > { %v277_v8 = vld [vmem:[#allocation2 + $0x1e0] sm:$0xff]  ;;  %301 = vmatpush.msra.mxu0 %v281_v4  ;;  %321 = vmatpush.msra.mxu1 %v282_v5  ;;  %v278_v9 = vld [vmem:[#allocation2 + $0x1e8] sm:$0xff]  ;;  %v279_v10 = vld [vmem:[#allocation2 + $0x1f0] sm:$0xff]  ;;  %s1161_s24 = scalar_select %p207_p2, %s1018_s15, 1  ;;  %vm630_vm3 = vcmask 1041408  }
  0x20   : > { %v280_v11 = vld [vmem:[#allocation2 + $0x1f8] sm:$0xff]  ;;  %341 = vmatpush.msra.mxu2 %v283_v6  ;;  %361 = vmatpush.msra.mxu3 %v284_v7  ;;  %v273_v12 = vld [vmem:[#allocation2 + $0x1c0] sm:$0xff]  ;;  %v274_v13 = vld [vmem:[#allocation2 + $0x1c8] sm:$0xff]  ;;  %s801_s28 = sshll.u32 %s1156_s21, 2  ;;  %s202_s20 = sand.u32 1, %s1010_s13  }
  0x21   : > { %302 = vmatpush.msra.mxu0 %v277_v8  ;;  %322 = vmatpush.msra.mxu1 %v278_v9  ;;  %v275_v14 = vld [vmem:[#allocation2 + $0x1d0] sm:$0xff]  ;;  %v276_v15 = vld [vmem:[#allocation2 + $0x1d8] sm:$0xff]  ;;  %v269_v16 = vld [vmem:[#allocation2 + $0x1a0] sm:$0xff]  ;;  %s800_s25 = sshll.u32 %s1161_s24, 1  ;;  %s691_s21 = sadd.s32 %s818_s11, %s817_s10 }
  0x22   : > { %342 = vmatpush.msra.mxu2 %v279_v10  ;;  %362 = vmatpush.msra.mxu3 %v280_v11  ;;  %v270_v17 = vld [vmem:[#allocation2 + $0x1a8] sm:$0xff]  ;;  %v271_v18 = vld [vmem:[#allocation2 + $0x1b0] sm:$0xff]  ;;  %v272_v19 = vld [vmem:[#allocation2 + $0x1b8] sm:$0xff]  ;;  %s211_s29 = sadd.s32 %s801_s28, %s800_s25  ;;  %s799_s15 = sshll.u32 %s202_s20, 3 }
  0x23   : > { %303 = vmatpush.msra.mxu0 %v273_v12  ;;  %323 = vmatpush.msra.mxu1 %v274_v13  ;;  %v265_v20 = vld [vmem:[#allocation2 + $0x180] sm:$0xff]  ;;  %v266_v21 = vld [vmem:[#allocation2 + $0x188] sm:$0xff]  ;;  %v267_v22 = vld [vmem:[#allocation2 + $0x190] sm:$0xff]  ;;  %s802_s30 = sshll.u32 %s211_s29, 3  ;;  %s819_s16 = sshll.u32 %s691_s21, 1 }
  0x24   : > { %343 = vmatpush.msra.mxu2 %v275_v14  ;;  %363 = vmatpush.msra.mxu3 %v276_v15  ;;  %v268_v23 = vld [vmem:[#allocation2 + $0x198] sm:$0xff]  ;;  %v261_v24 = vld [vmem:[#allocation2 + $0x160] sm:$0xff]  ;;  %v262_v25 = vld [vmem:[#allocation2 + $0x168] sm:$0xff]  ;;  %s1168_s6 = scalar_lea.vmem %s1242_s0, %s802_s30  ;;  %s693_s28 = scalar_lea.hbm %s1245_s3, %s819_s16 }
  0x25   : > { %304 = vmatpush.msra.mxu0 %v269_v16  ;;  %324 = vmatpush.msra.mxu1 %v270_v17  ;;  %v263_v26 = vld [vmem:[#allocation2 + $0x170] sm:$0xff]  ;;  %v264_v27 = vld [vmem:[#allocation2 + $0x178] sm:$0xff]  ;;  %v257_v28 = vld [vmem:[#allocation2 + $0x140] sm:$0xff]  ;;  %s204_s29 = scalar_lea.vmem [#allocation5], %s799_s15  ;;  %s697_s4 = sshll.u32 %s693_s28, 4  ;;  %s698_s4 = int_to_ptr.hbm [resolvable:$true] %s697_s4 }
  0x26   : > { %344 = vmatpush.msra.mxu2 %v271_v18  ;;  %364 = vmatpush.msra.mxu3 %v272_v19  ;;  %v258_v29 = vld [vmem:[#allocation2 + $0x148] sm:$0xff]  ;;  %v259_v30 = vld [vmem:[#allocation2 + $0x150] sm:$0xff]  ;;  %v260_v31 = vld [vmem:[#allocation2 + $0x158] sm:$0xff]  ;;  %s695_s30 = sshll.u32 %s204_s29, 4  ;;  %s680_s5 = scalar_lea.sflag [#allocation4], %s202_s20  ;;  %s696_s30 = int_to_ptr.vmem [resolvable:$true] %s695_s30 }
  0x27   : > { %305 = vmatpush.msra.mxu0 %v265_v20  ;;  %325 = vmatpush.msra.mxu1 %v266_v21  ;;  %v253_v32 = vld [vmem:[#allocation2 + $0x120] sm:$0xff]  ;;  %v254_v33 = vld [vmem:[#allocation2 + $0x128] sm:$0xff]  ;;  %v255_v34 = vld [vmem:[#allocation2 + $0x130] sm:$0xff]  ;;  %s956_s11 = scalar_lea.hbm %s1245_s3, 32 }
  0x28   : > { %345 = vmatpush.msra.mxu2 %v267_v22  ;;  %365 = vmatpush.msra.mxu3 %v268_v23  ;;  %v256_v35 = vld [vmem:[#allocation2 + $0x138] sm:$0xff]  ;;  %v247_v36 = vld [vmem:[#allocation2 + $0x100] sm:$0xff]  ;;  %v248_v37 = vld [vmem:[#allocation2 + $0x108] sm:$0xff] }
  0x29   : > { %306 = vmatpush.msra.mxu0 %v261_v24  ;;  %326 = vmatpush.msra.mxu1 %v262_v25  ;;  %v249_v38 = vld [vmem:[#allocation2 + $0x110] sm:$0xff]  ;;  %v250_v39 = vld [vmem:[#allocation2 + $0x118] sm:$0xff]  ;;  %v243_v40 = vld [vmem:[#allocation2 + $0xe0] sm:$0xff] }
  0x2a   : > { %346 = vmatpush.msra.mxu2 %v263_v26  ;;  %366 = vmatpush.msra.mxu3 %v264_v27  ;;  %v244_v41 = vld [vmem:[#allocation2 + $0xe8] sm:$0xff]  ;;  %v245_v42 = vld [vmem:[#allocation2 + $0xf0] sm:$0xff]  ;;  %v246_v43 = vld [vmem:[#allocation2 + $0xf8] sm:$0xff] }
  0x2b   : > { %307 = vmatpush.msra.mxu0 %v257_v28  ;;  %327 = vmatpush.msra.mxu1 %v258_v29  ;;  %v239_v44 = vld [vmem:[#allocation2 + $0xc0] sm:$0xff]  ;;  %v240_v45 = vld [vmem:[#allocation2 + $0xc8] sm:$0xff]  ;;  %v241_v46 = vld [vmem:[#allocation2 + $0xd0] sm:$0xff] }
  0x2c   : > { %347 = vmatpush.msra.mxu2 %v259_v30  ;;  %367 = vmatpush.msra.mxu3 %v260_v31  ;;  %v242_v47 = vld [vmem:[#allocation2 + $0xd8] sm:$0xff]  ;;  %v235_v48 = vld [vmem:[#allocation2 + $0xa0] sm:$0xff]  ;;  %v236_v49 = vld [vmem:[#allocation2 + $0xa8] sm:$0xff] }
  0x2d   : > { %308 = vmatpush.msra.mxu0 %v253_v32  ;;  %328 = vmatpush.msra.mxu1 %v254_v33  ;;  %v237_v50 = vld [vmem:[#allocation2 + $0xb0] sm:$0xff]  ;;  %v238_v51 = vld [vmem:[#allocation2 + $0xb8] sm:$0xff]  ;;  %v231_v52 = vld [vmem:[#allocation2 + $0x80] sm:$0xff] }
  0x2e   : > { %348 = vmatpush.msra.mxu2 %v255_v34  ;;  %368 = vmatpush.msra.mxu3 %v256_v35  ;;  %v232_v53 = vld [vmem:[#allocation2 + $0x88] sm:$0xff]  ;;  %v233_v54 = vld [vmem:[#allocation2 + $0x90] sm:$0xff]  ;;  %v234_v55 = vld [vmem:[#allocation2 + $0x98] sm:$0xff] }
  0x2f   : > { %383 = vmatpush.msrb.mxu0 %v247_v36  ;;  %403 = vmatpush.msrb.mxu1 %v248_v37  ;;  %v251_v56 = vld [vmem:[%s1168_s6 + $0x1] sm:$0xff]  ;;  %v229_v59 = vld [vmem:[#allocation2 + $0x70] sm:$0xff]  ;;  %v230_v60 = vld [vmem:[#allocation2 + $0x78] sm:$0xff] }
  0x30   : > { %423 = vmatpush.msrb.mxu2 %v249_v38  ;;  %443 = vmatpush.msrb.mxu3 %v250_v39  ;;  %v227_v57 = vld [vmem:[#allocation2 + $0x60] sm:$0xff]  ;;  %v228_v58 = vld [vmem:[#allocation2 + $0x68] sm:$0xff]  ;;  %v225_v63 = vld [vmem:[#allocation2 + $0x50] sm:$0xff] }
  0x31   : > { %384 = vmatpush.msrb.mxu0 %v243_v40  ;;  %404 = vmatpush.msrb.mxu1 %v244_v41  ;;  %v223_v61 = vld [vmem:[#allocation2 + $0x40] sm:$0xff]  ;;  %v224_v62 = vld [vmem:[#allocation2 + $0x48] sm:$0xff]  ;;  %v226_v0 = vld [vmem:[#allocation2 + $0x58] sm:$0xff] }
  0x32   : > { %424 = vmatpush.msrb.mxu2 %v245_v42  ;;  %444 = vmatpush.msrb.mxu3 %v246_v43  ;;  %v219_v1 = vld [vmem:[#allocation2 + $0x20] sm:$0xff]  ;;  %v220_v2 = vld [vmem:[#allocation2 + $0x28] sm:$0xff]  ;;  %v221_v3 = vld [vmem:[#allocation2 + $0x30] sm:$0xff] }
  0x33   : > { %385 = vmatpush.msrb.mxu0 %v239_v44  ;;  %405 = vmatpush.msrb.mxu1 %v240_v45  ;;  %v222_v4 = vld [vmem:[#allocation2 + $0x38] sm:$0xff]  ;;  %v215_v5 = vld [vmem:[#allocation2] sm:$0xff]  ;;  %v216_v6 = vld [vmem:[#allocation2 + $0x8] sm:$0xff] }
  0x34   : > { %425 = vmatpush.msrb.mxu2 %v241_v46  ;;  %445 = vmatpush.msrb.mxu3 %v242_v47  ;;  %v217_v7 = vld [vmem:[#allocation2 + $0x10] sm:$0xff]  ;;  %v218_v8 = vld [vmem:[#allocation2 + $0x18] sm:$0xff]  ;;  %v214_v9 = vld [vmem:[%s1168_s6] sm:$0xff] }
  0x35   : > { %386 = vmatpush.msrb.mxu0 %v235_v48  ;;  %406 = vmatpush.msrb.mxu1 %v236_v49  ;;  %v490_v10 = vld [vmem:[#allocation2 + $0x340] sm:$0xff]  ;;  %v491_v11 = vld [vmem:[#allocation2 + $0x348] sm:$0xff]  ;;  %v492_v12 = vld [vmem:[#allocation2 + $0x350] sm:$0xff] }
  0x36   : > { %426 = vmatpush.msrb.mxu2 %v237_v50  ;;  %446 = vmatpush.msrb.mxu3 %v238_v51  ;;  %v493_v13 = vld [vmem:[#allocation2 + $0x358] sm:$0xff]  ;;  %v486_v14 = vld [vmem:[#allocation2 + $0x320] sm:$0xff]  ;;  %v487_v15 = vld [vmem:[#allocation2 + $0x328] sm:$0xff] }
  0x37   : > { %387 = vmatpush.msrb.mxu0 %v231_v52  ;;  %407 = vmatpush.msrb.mxu1 %v232_v53  ;;  %v488_v16 = vld [vmem:[#allocation2 + $0x330] sm:$0xff]  ;;  %v489_v17 = vld [vmem:[#allocation2 + $0x338] sm:$0xff]  ;;  %v482_v18 = vld [vmem:[#allocation2 + $0x300] sm:$0xff] }
  0x38   : > { %427 = vmatpush.msrb.mxu2 %v233_v54  ;;  %447 = vmatpush.msrb.mxu3 %v234_v55  ;;  %v483_v19 = vld [vmem:[#allocation2 + $0x308] sm:$0xff]  ;;  %v484_v20 = vld [vmem:[#allocation2 + $0x310] sm:$0xff]  ;;  %v485_v21 = vld [vmem:[#allocation2 + $0x318] sm:$0xff] }
  0x39   : > { %805 = vmatmul.msk.f32.vlgmr.msra.gmra.mxu2 %vm289_vm0, %v251_v56  ;;  %806 = vmatmul.msk.f32.vlgmr.msra.gmra.mxu3 %vm289_vm0, %v251_v56  ;;  %v478_v22 = vld [vmem:[#allocation2 + $0x2e0] sm:$0xff]  ;;  %v479_v23 = vld [vmem:[#allocation2 + $0x2e8] sm:$0xff]  ;;  %v480_v24 = vld [vmem:[#allocation2 + $0x2f0] sm:$0xff] }
  0x3a   : > { %388 = vmatpush.msrb.mxu0 %v227_v57  ;;  %408 = vmatpush.msrb.mxu1 %v228_v58  ;;  %v481_v25 = vld [vmem:[#allocation2 + $0x2f8] sm:$0xff]  ;;  %v474_v26 = vld [vmem:[#allocation2 + $0x2c0] sm:$0xff]  ;;  %v475_v27 = vld [vmem:[#allocation2 + $0x2c8] sm:$0xff] }
  0x3b   : > { %428 = vmatpush.msrb.mxu2 %v229_v59  ;;  %448 = vmatpush.msrb.mxu3 %v230_v60  ;;  %v476_v28 = vld [vmem:[#allocation2 + $0x2d0] sm:$0xff]  ;;  %v477_v29 = vld [vmem:[#allocation2 + $0x2d8] sm:$0xff]  ;;  %v470_v30 = vld [vmem:[#allocation2 + $0x2a0] sm:$0xff] }
  0x3c   : > { %389 = vmatpush.msrb.mxu0 %v223_v61  ;;  %409 = vmatpush.msrb.mxu1 %v224_v62  ;;  %v471_v31 = vld [vmem:[#allocation2 + $0x2a8] sm:$0xff]  ;;  %v472_v32 = vld [vmem:[#allocation2 + $0x2b0] sm:$0xff]  ;;  %v473_v33 = vld [vmem:[#allocation2 + $0x2b8] sm:$0xff] }
  0x3d   : > { %429 = vmatpush.msrb.mxu2 %v225_v63  ;;  %449 = vmatpush.msrb.mxu3 %v226_v0  ;;  %v466_v34 = vld [vmem:[#allocation2 + $0x280] sm:$0xff]  ;;  %v467_v35 = vld [vmem:[#allocation2 + $0x288] sm:$0xff]  ;;  %v468_v36 = vld [vmem:[#allocation2 + $0x290] sm:$0xff] }
  0x3e   : > { %390 = vmatpush.msrb.mxu0 %v219_v1  ;;  %410 = vmatpush.msrb.mxu1 %v220_v2  ;;  %v469_v37 = vld [vmem:[#allocation2 + $0x298] sm:$0xff]  ;;  %v462_v38 = vld [vmem:[#allocation2 + $0x260] sm:$0xff]  ;;  %v463_v39 = vld [vmem:[#allocation2 + $0x268] sm:$0xff] }
  0x3f   : > { %430 = vmatpush.msrb.mxu2 %v221_v3  ;;  %450 = vmatpush.msrb.mxu3 %v222_v4  ;;  %v464_v40 = vld [vmem:[#allocation2 + $0x270] sm:$0xff]  ;;  %v465_v41 = vld [vmem:[#allocation2 + $0x278] sm:$0xff]  ;;  %v458_v42 = vld [vmem:[#allocation2 + $0x240] sm:$0xff] }
  0x40   : > { %804 = vmatmul.msk.f32.vlgmr.msra.gmra.mxu1 %vm289_vm0, %v251_v56  ;;  %391 = vmatpush.msrb.mxu0 %v215_v5  ;;  %v459_v43 = vld [vmem:[#allocation2 + $0x248] sm:$0xff]  ;;  %v460_v44 = vld [vmem:[#allocation2 + $0x250] sm:$0xff]  ;;  %v461_v45 = vld [vmem:[#allocation2 + $0x258] sm:$0xff] }
  0x41   : > { %411 = vmatpush.msrb.mxu1 %v216_v6  ;;  %431 = vmatpush.msrb.mxu2 %v217_v7  ;;  %v456_v46 = vld [vmem:[%s1168_s6 + $0x2] sm:$0xff]  ;;  %s950_s6 = sshra.s32 %s698_s4, 4  ;;  %s951_s6 = int_to_ptr.hbm [resolvable:$true] %s950_s6 }
  0x42   : > { %451 = vmatpush.msrb.mxu3 %v218_v8  ;;  %803 = vmatmul.msk.f32.vlgmr.msra.gmra.mxu0 %vm289_vm0, %v251_v56  ;;  %v581_v53 = vld [vmem:[%s1244_s2] sm:$0xf]  ;;  %s952_s7 = scalar_lea.hbm %s951_s6, 8  ;;  %p957_p7 = scmp.lt.s32.totalorder %s951_s6, %s1245_s3 }
  0x43   : > { %809 = vmatmul.msk.f32.vlgmr.msrb.gmra.mxu2 %vm289_vm0, %v214_v9  ;;  %810 = vmatmul.msk.f32.vlgmr.msrb.gmra.mxu3 %vm289_vm0, %v214_v9  ;;  %v583_v58 = vperm.slane %v581_v53, 0  ;;  %v584_v59 = vperm.slane %v581_v53, 1  ;;  %v585_v8 = vperm.slane %v581_v53, 2  ;;  %p953_p4 = scmp.ne.s32.totalorder %s951_s6, %s952_s7  ;;  %p958_p9 = scmp.lt.s32.totalorder %s956_s11, %s952_s7 }
  0x44   : > { %504 = vmatpush.msra.mxu0 %v490_v10  ;;  %524 = vmatpush.msra.mxu1 %v491_v11 }
  0x45   : > { %544 = vmatpush.msra.mxu2 %v492_v12  ;;  %564 = vmatpush.msra.mxu3 %v493_v13  ;;  %p954_p5 = pnand %p953_p4, %p1111_p3  ;;  %p959_p10 = por %p958_p9, %p957_p7 }
  0x46   : > { %505 = vmatpush.msra.mxu0 %v486_v14  ;;  %525 = vmatpush.msra.mxu1 %v487_v15 }
  0x47   : > { %545 = vmatpush.msra.mxu2 %v488_v16  ;;  %565 = vmatpush.msra.mxu3 %v489_v17  ;;  %p955_p6 = pneg %p954_p5 }
  0x48   : > { %506 = vmatpush.msra.mxu0 %v482_v18  ;;  %526 = vmatpush.msra.mxu1 %v483_v19 }
  0x49   : > { %546 = vmatpush.msra.mxu2 %v484_v20  ;;  %566 = vmatpush.msra.mxu3 %v485_v21  ;;  %p960_p11 = pnand %p959_p10, %p955_p6 }
  0x4a   : > { %808 = vmatmul.msk.f32.vlgmr.msrb.gmra.mxu1 %vm289_vm0, %v214_v9  ;;  %507 = vmatpush.msra.mxu0 %v478_v22 }
  0x4b   : > { %527 = vmatpush.msra.mxu1 %v479_v23  ;;  %547 = vmatpush.msra.mxu2 %v480_v24 }
  0x4c   : > { %567 = vmatpush.msra.mxu3 %v481_v25  ;;  %807 = vmatmul.msk.f32.vlgmr.msrb.gmra.mxu0 %vm289_vm0, %v214_v9  ;;  %v586_v9 = vperm.slane %v581_v53, 3 }
  0x4d   : > { %508 = vmatpush.msra.mxu0 %v474_v26  ;;  %528 = vmatpush.msra.mxu1 %v475_v27 }
  0x4e   : > { %548 = vmatpush.msra.mxu2 %v476_v28  ;;  %568 = vmatpush.msra.mxu3 %v477_v29 }
  0x4f   : > { %509 = vmatpush.msra.mxu0 %v470_v30  ;;  %529 = vmatpush.msra.mxu1 %v471_v31 }
  0x50   : > { %549 = vmatpush.msra.mxu2 %v472_v32  ;;  %569 = vmatpush.msra.mxu3 %v473_v33 }
  0x51   : > { %510 = vmatpush.msra.mxu0 %v466_v34  ;;  %530 = vmatpush.msra.mxu1 %v467_v35 }
  0x52   : > { %550 = vmatpush.msra.mxu2 %v468_v36  ;;  %570 = vmatpush.msra.mxu3 %v469_v37 }
  0x53   : > { %511 = vmatpush.msra.mxu0 %v462_v38  ;;  %531 = vmatpush.msra.mxu1 %v463_v39 }
  0x54   : > { %551 = vmatpush.msra.mxu2 %v464_v40  ;;  %571 = vmatpush.msra.mxu3 %v465_v41 }
  0x55   : > { %512 = vmatpush.msra.mxu0 %v458_v42  ;;  %532 = vmatpush.msra.mxu1 %v459_v43 }
  0x56   : > { %552 = vmatpush.msra.mxu2 %v460_v44  ;;  %572 = vmatpush.msra.mxu3 %v461_v45 }
  0x57   : > { %811 = vmatmul.msk.f32.vlgmr.msra.gmra.mxu0 %vm289_vm0, %v456_v46  ;;  %812 = vmatmul.msk.f32.vlgmr.msra.gmra.mxu1 %vm289_vm0, %v456_v46 }
  0x58   : > { %813 = vmatmul.msk.f32.vlgmr.msra.gmra.mxu2 %vm289_vm0, %v456_v46  ;;  %814 = vmatmul.msk.f32.vlgmr.msra.gmra.mxu3 %vm289_vm0, %v456_v46 }
  0xbc   : > { %v350_v49 = vpop.f32.mrf.mxu2  ;;  %v370_v50 = vpop.f32.mrf.mxu3 }
  0xbd   : > { %v330_v48 = vpop.f32.mrf.mxu1 }
  0xbf   : > { %v310_v47 = vpop.f32.mrf.mxu0 }
  0xc6   : > { %v433_v55 = vpop.f32.mrf.mxu2  ;;  %v453_v56 = vpop.f32.mrf.mxu3 }
  0xc7   : > { %v413_v52 = vpop.f32.mrf.mxu1  ;;  %v434_v6 = vadd.f32 %v433_v55, %v350_v49  ;;  %v454_v7 = vadd.f32 %v453_v56, %v370_v50 }
  0xc8   : > { %v414_v54 = vadd.f32 %v413_v52, %v330_v48 }
  0xc9   : > { %v393_v51 = vpop.f32.mrf.mxu0 }
  0xca   : > { %v394_v57 = vadd.f32 %v393_v51, %v310_v47 }
  0xd4   : > { %v514_v60 = vpop.f32.mrf.mxu0  ;;  %v534_v61 = vpop.f32.mrf.mxu1 }
  0xd5   : > { %v577_v62 = vadd.f32 %v514_v60, %v394_v57  ;;  %v578_v63 = vadd.f32 %v534_v61, %v414_v54  ;;  %v633_v57 = vlaneseq }
  0xd7   : > { %v591_v0 = vsub.f32 %v577_v62, %v583_v58  ;;  %v592_v1 = vsub.f32 %v578_v63, %v584_v59  ;;  %vm635_vm4 = vcmp.lt.s32.totalorder %v633_v57, 512 }
  0xd9   : > { %v595_v2 = vrot.slane %v591_v0, 4  ;;  %v638_v3 = vmul.f32 %v591_v0, %v591_v0  ;;  %v601_v4 = vrot.slane %v592_v1, 4  ;;  %v639_v5 = vmul.f32 %v592_v1, %v592_v1 }
  0xdb   : > { %v596_v10 = vadd.f32 %v595_v2, %v591_v0  ;;  %v642_v11 = vrot.slane %v638_v3, 4  ;;  %v602_v12 = vadd.f32 %v601_v4, %v592_v1  ;;  %v648_v13 = vrot.slane %v639_v5, 4  ;;  %v554_v14 = vpop.f32.mrf.mxu2  ;;  %v574_v15 = vpop.f32.mrf.mxu3 }
  0xdc   : > { %v579_v16 = vadd.f32 %v554_v14, %v434_v6  ;;  %v580_v17 = vadd.f32 %v574_v15, %v454_v7 }
  0xdd   : > { %v643_v18 = vadd.f32 %v642_v11, %v638_v3  ;;  %v603_v19 = vrot.slane %v602_v12, 2  ;;  %v649_v20 = vadd.f32 %v648_v13, %v639_v5  ;;  %v597_v23 = vrot.slane %v596_v10, 2 }
  0xde   : > { %v593_v21 = vsub.f32 %v579_v16, %v585_v8  ;;  %v594_v22 = vsub.f32 %v580_v17, %v586_v9 }
  0xdf   : > { %v604_v24 = vadd.f32 %v603_v19, %v602_v12  ;;  %v650_v25 = vrot.slane %v649_v20, 2  ;;  %v644_v30 = vrot.slane %v643_v18, 2  ;;  %v598_v37 = vadd.f32 %v597_v23, %v596_v10 }
  0xe0   : > { %v607_v26 = vrot.slane %v593_v21, 4  ;;  %v640_v27 = vmul.f32 %v593_v21, %v593_v21  ;;  %v613_v28 = vrot.slane %v594_v22, 4  ;;  %v641_v29 = vmul.f32 %v594_v22, %v594_v22 }
  0xe1   : > { %v605_v31 = vrot.slane %v604_v24, 1  ;;  %v651_v32 = vadd.f32 %v650_v25, %v649_v20  ;;  %v645_v43 = vadd.f32 %v644_v30, %v643_v18  ;;  %v599_v49 = vrot.slane %v598_v37, 1 }
  0xe2   : > { %v608_v33 = vadd.f32 %v607_v26, %v593_v21  ;;  %v654_v34 = vrot.slane %v640_v27, 4  ;;  %v614_v35 = vadd.f32 %v613_v28, %v594_v22  ;;  %v660_v36 = vrot.slane %v641_v29, 4 }
  0xe3   : > { %v652_v38 = vrot.slane %v651_v32, 1  ;;  %v606_v44 = vadd.f32 %v605_v31, %v604_v24  ;;  %v646_v55 = vrot.slane %v645_v43, 1  ;;  %v600_v62 = vadd.f32 %v599_v49, %v598_v37 }
  0xe4   : > { %v609_v39 = vrot.slane %v608_v33, 2  ;;  %v655_v40 = vadd.f32 %v654_v34, %v640_v27  ;;  %v615_v41 = vrot.slane %v614_v35, 2  ;;  %v661_v42 = vadd.f32 %v660_v36, %v641_v29 }
  0xe5   : > { %v653_v50 = vadd.f32 %v652_v38, %v651_v32  ;;  %v623_v56 = vrot.slane %v606_v44, 7  ;;  %v647_v4 = vadd.f32 %v646_v55, %v645_v43 }
  0xe6   : > { %v610_v45 = vadd.f32 %v609_v39, %v608_v33  ;;  %v656_v46 = vrot.slane %v655_v40, 2  ;;  %v616_v47 = vadd.f32 %v615_v41, %v614_v35  ;;  %v662_v48 = vrot.slane %v661_v42, 2 }
  0xe7   : > { %v670_v63 = vrot.slane %v653_v50, 7  ;;  %v627_v7 = vsel %vm626_vm1, %v600_v62, %v623_v56 }
  0xe8   : > { %v611_v51 = vrot.slane %v610_v45, 1  ;;  %v657_v52 = vadd.f32 %v656_v46, %v655_v40  ;;  %v617_v53 = vrot.slane %v616_v47, 1  ;;  %v663_v54 = vadd.f32 %v662_v48, %v661_v42 }
  0xe9   : > { %v673_v10 = vsel %vm626_vm1, %v647_v4, %v670_v63 }
  0xea   : > { %v612_v58 = vadd.f32 %v611_v51, %v610_v45  ;;  %v658_v59 = vrot.slane %v657_v52, 1  ;;  %v618_v60 = vadd.f32 %v617_v53, %v616_v47  ;;  %v664_v61 = vrot.slane %v663_v54, 1 }
  0xec   : > { %v624_v0 = vrot.slane %v612_v58, 6  ;;  %v659_v1 = vadd.f32 %v658_v59, %v657_v52  ;;  %v625_v2 = vrot.slane %v618_v60, 5  ;;  %v665_v3 = vadd.f32 %v664_v61, %v663_v54 }
  0xee   : > { %v671_v5 = vrot.slane %v659_v1, 6  ;;  %v672_v6 = vrot.slane %v665_v3, 5  ;;  %v629_v8 = vsel %vm628_vm2, %v624_v0, %v625_v2 }
  0xef   : > { %v631_v9 = vsel %vm630_vm3, %v627_v7, %v629_v8 }
  0xf0   : > { %637 = vst.msk [vmem:[%s204_s29] ss:$2 sm:$0xf] %vm635_vm4, %v631_v9  ;;  %v674_v11 = vsel %vm628_vm2, %v671_v5, %v672_v6 }
  0xf1   : > { %v675_v12 = vsel %vm630_vm3, %v673_v10, %v674_v11 }
  0xf2   : > { %815 = vst.msk [vmem:[%s204_s29 + $0x1] ss:$2 sm:$0xf] %vm635_vm4, %v675_v12 }
  0xf3   : > { %963 = shalt.err (!%p960_p11)
}
  0xf4   : > { %826 = dma.vmem_to_hbm [thread:$0]  (%p1111_p3), %s696_s30, 128, %s698_s4, %s680_s5  }
  0xf5 PF: > { %p838_p12 = scmp.ge.s32.totalorder %s1034_s19, 2  ;;  %s709_s20 = sand.u32 1, %s1006_s12  }
  0xf6   : > { %s710_s16 = scalar_lea.sflag [#allocation4], %s709_s20 }
  0xf7   : > { %p833_p13 = pnand %p838_p12, %p1120_p8 }
  0xf9   : > { %p834_p0 = pneg %p833_p13 }
  0xfb   : > { %1001 = dma.done.wait (%p834_p0), %s710_s16, 128  }
  0xfc   : > { %1003 = vsyncadd (%p834_p0), %s710_s16, 4294967168  ;;  %s17_s19 = sadd.s32 1, %s1034_s19   ;;  %s1250_s12 = smov %s1010_s13 }
  0xfd   : > { %p14_p1 = scmp.ge.s32.totalorder %s17_s19, 6   ;;  %s1251_s13 = smov %s1014_s14 }
  0xfe   : > { %s1252_s14 = smov %s1141_s8  ;;  %s1253_s15 = smov %s1026_s17 }
  0xff   : > { %s1254_s16 = smov %s1030_s18  ;;  %s1255_s17 = smov %s1258_s22 }
 0x100   : > { %s1256_s18 = smov %s1262_s23  ;;  %16 = sbr.rel (!%p14_p1) target bundleno = 6 (0x6), region = 75 }
 0x105   :  { %716 = vsyncpa [#allocation3], 1 }
 0x106   :  { %718 = vsyncpa [#allocation3 + $0x1], 1 }
 0x107   :  { %719 = vsyncpa [#allocation4], 1 }
 0x108   :  { %721 = vsyncpa [#allocation4 + $0x1], 1 }

</bundles_post_ra>
